<compile_context>
chip_gen: v5e
topology: v5e:2x2
jax: 0.10.0
libtpu: 0.0.40
codegen_flags: <defaults>
</compile_context>

<pallas_src>
import numpy as np
import jax
import jax.numpy as jnp
from jax.experimental import pallas as pl
from jax.experimental.pallas import tpu as pltpu


def _round_up(x: int, m: int) -> int:
    return ((x + m - 1) // m) * m


def _make_dis_error_kernel(inv_n: float):
    def kernel(val_ref, xT_ref, tgt_ref, out_ref, acc_ref):
        i = pl.program_id(0)

        @pl.when(i == 0)
        def _init():
            acc_ref[0] = jnp.float32(0.0)

        x = xT_ref[...].astype(jnp.float32)     # [C, TN]   one-hot / prob scores (transposed)
        t = tgt_ref[...].astype(jnp.float32)    # [1, TN]   target scores
        v = val_ref[...].astype(jnp.float32)    # [C, 1]    class -> float score values

        # pred[n] = sum_c x[c, n] * value[c]   (== oneHotToFloat)
        pred = jnp.sum(x * v, axis=0, keepdims=True)        # [1, TN]
        diff = t - pred                                      # padded lanes are 0 - 0
        acc_ref[0] += jnp.sum(diff * diff)                   # fused partial sum

        @pl.when(i == pl.num_programs(0) - 1)
        def _finalize():
            out_ref[0, 0] = acc_ref[0] * jnp.float32(inv_n)  # single 1/N at the end

    return kernel


def dis_error(inp: jax.Array, target: jax.Array, step: float,
              *, block_n: int = 8192, use_pallas: bool = True) -> jax.Array:
    """Pallas implementation of disError.forward.  Returns a float32 scalar."""
    N, C = inp.shape
    target = target.reshape(N)
    values = np.arange(1.0, 5.0, step, dtype=np.float32)
    assert values.shape[0] == C, (values.shape, C)

    if not use_pallas:
        # tiny-input fast path: 3-op reduction, cheaper than any kernel launch
        pred = inp.astype(jnp.float32) @ jnp.asarray(values)
        return jnp.mean((target.astype(jnp.float32) - pred) ** 2)

    # Lane-dense layout: big batch axis on the 128-wide lane axis.
    xT = jnp.transpose(inp)             # [C, N]
    tgt = target.reshape(1, N)          # [1, N]

    # Balanced batch tiling: tn is a multiple of 128, padding bounded by ~128*tiles.
    n128 = _round_up(N, 128)
    num_tiles = pl.cdiv(n128, block_n)
    tn = _round_up(pl.cdiv(n128, num_tiles), 128)
    n_pad = tn * num_tiles
    if n_pad != N:
        xT = jnp.pad(xT, ((0, 0), (0, n_pad - N)))
        tgt = jnp.pad(tgt, ((0, 0), (0, n_pad - N)))

    vals = jnp.asarray(values).reshape(C, 1)

    out = pl.pallas_call(
        _make_dis_error_kernel(1.0 / N),
        out_shape=jax.ShapeDtypeStruct((1, 1), jnp.float32),
        grid_spec=pltpu.PrefetchScalarGridSpec(
            num_scalar_prefetch=0,
            grid=(num_tiles,),
            in_specs=[
                pl.BlockSpec((C, 1), lambda i: (0, 0)),    # class value vector (resident)
                pl.BlockSpec((C, tn), lambda i: (0, i)),   # transposed scores, batch tile
                pl.BlockSpec((1, tn), lambda i: (0, i)),   # targets, batch tile
            ],
            out_specs=pl.BlockSpec(memory_space=pltpu.MemorySpace.SMEM),
            scratch_shapes=[pltpu.SMEM((1,), jnp.float32)],
        ),
        compiler_params=pltpu.CompilerParams(
            dimension_semantics=("arbitrary",),            # carried accumulation
        ),
    )(vals, xT, tgt)
    return out[0, 0]


def _reference(inp, target, step):
    values = jnp.arange(1.0, 5.0, step, dtype=jnp.float32)
    pred = inp.astype(jnp.float32) @ values
    return jnp.mean((target.astype(jnp.float32) - pred) ** 2)


if __name__ == "__main__":
    key = jax.random.PRNGKey(0)
    k1, k2, k3, k4 = jax.random.split(key, 4)

    step = 0.5
    C = int(4 / step)   # 8 one-hot bins covering scores [1, 5)

    # Small shape: batch of 16 class-probability rows + PESQ-like targets in [1, 5].
    N = 16
    inp = jax.nn.softmax(jax.random.normal(k1, (N, C), jnp.float32), axis=-1)
    target = 1.0 + 4.0 * jax.random.uniform(k2, (N,), dtype=jnp.float32)

    loss = jax.block_until_ready(dis_error(inp, target, step))
    ref = _reference(inp, target, step)
    assert jnp.allclose(loss, ref, rtol=1e-5, atol=1e-6), (loss, ref)

    # Larger batch with a forced small tile: exercises the multi-step grid
    # accumulator and the batch-padding path (N=1000 pads to 1024 = 4 x 256).
    N2 = 1000
    inp2 = jax.nn.softmax(jax.random.normal(k3, (N2, C), jnp.float32), axis=-1)
    target2 = 1.0 + 4.0 * jax.random.uniform(k4, (N2,), dtype=jnp.float32)

    loss2 = jax.block_until_ready(dis_error(inp2, target2, step, block_n=256))
    ref2 = _reference(inp2, target2, step)
    assert jnp.allclose(loss2, ref2, rtol=1e-5, atol=1e-6), (loss2, ref2)

    # Tiny-input fast path agrees as well.
    loss3 = dis_error(inp, target, step, use_pallas=False)
    assert jnp.allclose(loss3, ref, rtol=1e-5, atol=1e-6), (loss3, ref)

    print("KERNEL_OK")
</pallas_src>

<mosaic_0001>
module attributes {stable_mosaic.version = 11 : i64} {
  func.func @kernel(%arg0: i32, %arg1: memref<8x1xf32, #tpu.memory_space<vmem>>, %arg2: memref<8x128xf32, #tpu.memory_space<vmem>>, %arg3: memref<1x128xf32, #tpu.memory_space<vmem>>, %arg4: memref<1x1xf32, #tpu.memory_space<smem>>, %arg5: memref<1xf32, #tpu.memory_space<smem>>) attributes {dimension_semantics = [#tpu.dimension_semantics<arbitrary>], iteration_bounds = array<i64: 1>, scalar_prefetch = 0 : i64, scratch_operands = 1 : i64, tpu.core_type = #tpu.core_type<tc>, window_params = [{pipeline_mode = #tpu.pipeline_mode<synchronous>, transform_indices = @transform_0, window_bounds = array<i64: 8, 1>}, {transform_indices = @transform_1, window_bounds = array<i64: 8, 128>}, {transform_indices = @transform_2, window_bounds = array<i64: 1, 128>}, {transform_indices = @transform_3, window_bounds = array<i64: 1, 1>}]} {
    %c0_i32 = arith.constant 0 : i32
    %0 = arith.cmpi eq, %arg0, %c0_i32 : i32
    %1 = arith.extui %0 : i1 to i32
    %c0_i32_0 = arith.constant 0 : i32
    %2 = arith.cmpi ne, %1, %c0_i32_0 : i32
    scf.if %2 {
      %cst_11 = arith.constant 0.000000e+00 : f32
      %c0_12 = arith.constant 0 : index
      %22 = memref.load %arg5[%c0_12] : memref<1xf32, #tpu.memory_space<smem>>
      memref.store %cst_11, %arg5[%c0_12] : memref<1xf32, #tpu.memory_space<smem>>
    } else {
    }
    %c0 = arith.constant 0 : index
    %c0_1 = arith.constant 0 : index
    %3 = vector.load %arg2[%c0, %c0_1] : memref<8x128xf32, #tpu.memory_space<vmem>>, vector<8x128xf32>
    %c0_2 = arith.constant 0 : index
    %c0_3 = arith.constant 0 : index
    %4 = vector.load %arg3[%c0_2, %c0_3] : memref<1x128xf32, #tpu.memory_space<vmem>>, vector<1x128xf32>
    %c0_4 = arith.constant 0 : index
    %c0_5 = arith.constant 0 : index
    %5 = vector.load %arg1[%c0_4, %c0_5] : memref<8x1xf32, #tpu.memory_space<vmem>>, vector<8x1xf32>
    %6 = vector.broadcast %5 : vector<8x1xf32> to vector<8x128xf32>
    %7 = arith.mulf %3, %6 : vector<8x128xf32>
    %cst = arith.constant dense<0.000000e+00> : vector<128xf32>
    %8 = vector.multi_reduction <add>, %7, %cst [0] : vector<8x128xf32> to vector<128xf32>
    %9 = vector.shape_cast %8 : vector<128xf32> to vector<1x128xf32>
    %10 = arith.subf %4, %9 : vector<1x128xf32>
    %c0_6 = arith.constant 0 : index
    %11 = memref.load %arg5[%c0_6] : memref<1xf32, #tpu.memory_space<smem>>
    %12 = arith.mulf %10, %10 : vector<1x128xf32>
    %13 = vector.shape_cast %12 : vector<1x128xf32> to vector<1x1x128xf32>
    %cst_7 = arith.constant dense<0.000000e+00> : vector<1xf32>
    %14 = vector.multi_reduction <add>, %13, %cst_7 [1, 2] : vector<1x1x128xf32> to vector<1xf32>
    %15 = vector.shape_cast %14 : vector<1xf32> to vector<1x1x1xf32>
    %16 = vector.extract %15[0, 0, 0] : f32 from vector<1x1x1xf32>
    %17 = arith.addf %11, %16 : f32
    %c0_8 = arith.constant 0 : index
    %18 = memref.load %arg5[%c0_8] : memref<1xf32, #tpu.memory_space<smem>>
    memref.store %17, %arg5[%c0_8] : memref<1xf32, #tpu.memory_space<smem>>
    %c0_i32_9 = arith.constant 0 : i32
    %19 = arith.cmpi eq, %arg0, %c0_i32_9 : i32
    %20 = arith.extui %19 : i1 to i32
    %c0_i32_10 = arith.constant 0 : i32
    %21 = arith.cmpi ne, %20, %c0_i32_10 : i32
    scf.if %21 {
      %c0_11 = arith.constant 0 : index
      %22 = memref.load %arg5[%c0_11] : memref<1xf32, #tpu.memory_space<smem>>
      %cst_12 = arith.constant 6.250000e-02 : f32
      %23 = arith.mulf %22, %cst_12 : f32
      %c0_13 = arith.constant 0 : index
      %c0_14 = arith.constant 0 : index
      %24 = memref.load %arg4[%c0_13, %c0_14] : memref<1x1xf32, #tpu.memory_space<smem>>
      memref.store %23, %arg4[%c0_13, %c0_14] : memref<1x1xf32, #tpu.memory_space<smem>>
    } else {
    }
    return
  }
  func.func @transform_0(%arg0: i32) -> (i32, i32) {
    %c0_i32 = arith.constant 0 : i32
    %c0_i32_0 = arith.constant 0 : i32
    %c0_i32_1 = arith.constant 0 : i32
    return %c0_i32, %c0_i32_0 : i32, i32
  }
  func.func @transform_1(%arg0: i32) -> (i32, i32) {
    %c0_i32 = arith.constant 0 : i32
    %c0_i32_0 = arith.constant 0 : i32
    return %c0_i32, %arg0 : i32, i32
  }
  func.func @transform_2(%arg0: i32) -> (i32, i32) {
    %c0_i32 = arith.constant 0 : i32
    %c0_i32_0 = arith.constant 0 : i32
    return %c0_i32, %arg0 : i32, i32
  }
  func.func @transform_3(%arg0: i32) -> (i32, i32) {
    %c0_i32 = arith.constant 0 : i32
    %c0_i32_0 = arith.constant 0 : i32
    %c0_i32_1 = arith.constant 0 : i32
    return %c0_i32, %c0_i32_0 : i32, i32
  }
}

</mosaic_0001>

<bundles_post_ra>
// kernel: tpu_custom_call.1
= control target key start
LH: loop header
LB: loop body
LE: loop exit
PB: predicated region body
PF: predicated region fallthrough
CT: control target
= control target key end

     0   :  { %s128_s0 = inlined_call_operand.vmem [shape: f32[8,1], index: 0, kind: input, shape index: {}]   ;;  %s129_s1 = inlined_call_operand.vmem [shape: f32[8,128], index: 1, kind: input, shape index: {}]   ;;  %s130_s2 = inlined_call_operand.vmem [shape: f32[1,128], index: 2, kind: input, shape index: {}]   ;;  %s131_s3 = inlined_call_operand.hbm [shape: f32[1,1], index: 3, kind: output, shape index: {}]  }
   0x1   :  { %v23_v0 = vld [vmem:[%s128_s0] sm:$0xff] }
   0x2   :  { %8 = vsyncpa [#allocation4], 0  ;;  %v94_v1 = vmov 0   ;;  %v21_v2 = vld [vmem:[%s129_s1] sm:$0xff]  ;;  %vm39_vm0 = vcmask 1040384   ;;  %s65_s18 = sshll.u32 %s131_s3, 4  ;;  %s66_s18 = int_to_ptr.hbm [resolvable:$true] %s65_s18 }
   0x3   :  { %79 = vset.pattern.permute.xlu0 %v94_v1  ;;  %v22_v10 = vld [vmem:[%s130_s2] sm:$0x1]  ;;  %s95_s20 = smov [#allocation3]  }
   0x4   :  { %26 = vperm.xlu0 %79, %v23_v0  }
  0x76   :  { %v27_v3 = vpop.permute.xlu0 %26 }
  0x77   :  { %v29_v4 = vmul.f32 %v27_v3, %v21_v2 }
  0x79   :  { %v30_v5 = vrot.slane %v29_v4, 4 }
  0x7b   :  { %v31_v6 = vadd.f32 %v30_v5, %v29_v4 }
  0x7d   :  { %v32_v7 = vrot.slane %v31_v6, 2 }
  0x7f   :  { %v33_v8 = vadd.f32 %v32_v7, %v31_v6 }
  0x81   :  { %v34_v9 = vrot.slane %v33_v8, 1 }
  0x83   :  { %v35_v11 = vadd.f32 %v34_v9, %v33_v8 }
  0x85   :  { %v36_v12 = vsub.f32 %v22_v10, %v35_v11 }
  0x87   :  { %v38_v13 = vmul.f32 %v36_v12, %v36_v12 }
  0x89   :  { %v40_v14 = vsel %vm39_vm0, %v38_v13, 0.0 }
  0x8a   :  { %41 = vadd.xlane.f32.xlu0 %v40_v14 }
  0xfd   :  { %v42_v15 = vpop.xlane.xlu0 %41 }
  0xfe   :  { %v43_v16 = vrot.slane %v42_v15, 4 }
 0x100   :  { %v44_v17 = vadd.f32 %v43_v16, %v42_v15 }
 0x102   :  { %v45_v18 = vrot.slane %v44_v17, 2 }
 0x104   :  { %v46_v19 = vadd.f32 %v45_v18, %v44_v17 }
 0x106   :  { %v47_v20 = vrot.slane %v46_v19, 1 }
 0x108   :  { %v48_v21 = vadd.f32 %v47_v20, %v46_v19 }
 0x10a   :  { %75 = vpush %v48_v21 }
 0x13b   :  { %s76_s19 = spop %75 }
 0x13c   :  { %s57_s2 = smul.f32 0.0625, %s76_s19 }
 0x13e   :  { %59 = sst [smem:[#allocation3]] %s57_s2 }
 0x13f   :  { %68 = dma.smem_to_hbm %s95_s20, 16, %s66_s18, [#allocation4]  }
 0x140   :  { %92 = dma.done.wait [#allocation4], 16  }
 0x141   :  { %93 = vsyncadd [#allocation4], 4294967280 }
 0x142   :  { %73 = sfence }
 0x143   :  { %74 = vsyncpa [#allocation4], 1 }

</bundles_post_ra>
